<compile_context>
chip_gen: v7x
topology: tpu7x:2x2x1
jax: 0.10.0
libtpu: 0.0.40
codegen_flags: <defaults>
</compile_context>

<pallas_src>
import functools

import jax
import jax.numpy as jnp
from jax.experimental import pallas as pl
from jax.experimental.pallas import tpu as pltpu


def _fcn_head_kernel(x_ref, w1_ref, bnb_ref, w2_ref, b2_ref, out_ref, *,
                     H, W, NB, use_mxu_1x1):
    """Fused FCN head for one batch block of NB images.

    x_ref  : (NB, Cin, H*W)   bf16 NCHW input, spatial dims flattened on lanes
    w1_ref : (9, Cmid, Cin)   bf16 3x3 conv weights (BN scale folded), tap-major
    bnb_ref: (Cmid, 1)        f32 folded BN bias
    w2_ref : (Cmid, Cout, 1)  f32 1x1 weights (VPU path)  /  (Cout, Cmid) bf16 (MXU path)
    b2_ref : (Cout, 1)        f32 1x1 conv bias
    out_ref: (NB, Cout, H*W)  f32 output
    """
    HW = H * W
    Cmid = bnb_ref.shape[0]
    Cout = out_ref.shape[1]

    # ---- zero-padding border masks, built in-kernel (no HBM mask input) ----
    # Built directly at (Cmid, HW) so the per-tap select has no i1 broadcasting.
    lane = jax.lax.broadcasted_iota(jnp.int32, (Cmid, HW), 1)
    if (W & (W - 1)) == 0:                       # power-of-two W: pure bit ops on the VPU
        col = jnp.bitwise_and(lane, W - 1)
        row = jnp.right_shift(lane, W.bit_length() - 1)
    else:                                        # general case (not exercised in the demo)
        col = lane % W
        row = lane // W

    def tap_mask(dy, dx):
        m = None
        if dy == -1:
            m = row >= 1
        elif dy == 1:
            m = row < (H - 1)
        if dx == -1:
            c = col >= 1
            m = c if m is None else jnp.logical_and(m, c)
        elif dx == 1:
            c = col < (W - 1)
            m = c if m is None else jnp.logical_and(m, c)
        return m                                 # (Cmid, HW) bool, or None for centre tap

    taps = []
    k = 0
    for dy in (-1, 0, 1):
        for dx in (-1, 0, 1):
            taps.append((k, dy, dx, tap_mask(dy, dx)))
            k += 1

    # Bias broadcasts hoisted out of the per-image loop (JAX does not CSE them).
    bnb_full = jnp.broadcast_to(bnb_ref[...], (Cmid, HW))
    b2_full = jnp.broadcast_to(b2_ref[...], (Cout, HW))

    for nb in range(NB):                         # static unroll over images in this block
        x_img = x_ref[nb].astype(jnp.float32)    # (Cin, HW); bf16 in VMEM, f32 for rolls/masks

        # 3x3 conv as 9 accumulating MXU dots (no 9x im2col slab is ever built).
        # The spatial zero-padding mask is applied AFTER the dot, to the small
        # (Cmid, HW) f32 tap — identical result since the mask is per-pixel.
        acc = bnb_full                           # fold BN bias into the accumulator init
        for tk, dy, dx, mask in taps:
            if dy == 0 and dx == 0:
                src = x_img
            else:
                shift = (-(dy * W + dx)) % HW
                src = pltpu.roll(x_img, shift, axis=1)      # XLU lane rotation, static shift
            tap = jnp.dot(w1_ref[tk], src.astype(jnp.bfloat16),
                          preferred_element_type=jnp.float32)   # (Cmid, HW), bf16 MXU, f32 acc
            if mask is not None:
                tap = jnp.where(mask, tap, 0.0)
            acc = acc + tap

        h = jnp.maximum(acc, 0.0)                # (BN bias already added) + ReLU
        # TODO(synk): training-mode Dropout(0.1) intentionally omitted (identity in eval).

        if use_mxu_1x1:
            out = jnp.dot(w2_ref[...], h.astype(jnp.bfloat16),
                          preferred_element_type=jnp.float32) + b2_full
        else:
            # Tiny Cmid: 1x1 conv as Cmid broadcast-FMAs on the VPU (a K=Cmid MXU
            # dot would pad the contraction to full MXU width and stall on the
            # result FIFO; these FMAs overlap with the 3x3 GEMM drain).
            out = b2_full
            for c in range(Cmid):
                out = out + w2_ref[c] * h[c:c + 1, :]       # (Cout,1)*(1,HW) broadcast FMA

        out_ref[nb] = out.astype(out_ref.dtype)              # lane-dense unmasked store


def fcn_head_forward(x_nchw, w1_hwio, bn_gamma, bn_beta, bn_mean, bn_var,
                     w2_io, b2, *, eps=1e-5):
    """Forward matching _FCNHead.forward (eval mode). Input/Output are NCHW."""
    N, Cin, H, W = x_nchw.shape
    Cmid = w1_hwio.shape[-1]
    Cout = w2_io.shape[-1]
    HW = H * W

    # Batch blocking: keep >=2 grid steps when possible (v7x has 2 TensorCores),
    # while packing N//2 images into each step to amortize per-step overhead.
    if N >= 2 and N % 2 == 0:
        num_blocks, NB = 2, N // 2
    else:
        num_blocks, NB = N, 1

    # NCHW is already channels-on-sublanes / pixels-on-lanes: free reshape + bf16 cast
    # (halves the input DMA; in a real pipeline the activations arrive as bf16).
    x_flat = x_nchw.reshape(N, Cin, HW).astype(jnp.bfloat16)

    # Fold eval-mode BatchNorm into the (bias-free) 3x3 conv: scale -> weights, rest -> bias.
    bn_scale = bn_gamma / jnp.sqrt(bn_var + eps)
    bn_bias = bn_beta - bn_mean * bn_scale

    # (3,3,Cin,Cmid) -> (9, Cmid, Cin), tap-major so the kernel indexes w1_ref[k] cleanly.
    w1_folded = (jnp.transpose(w1_hwio.reshape(9, Cin, Cmid), (0, 2, 1))
                 * bn_scale[None, :, None]).astype(jnp.bfloat16)
    bnb = bn_bias.reshape(Cmid, 1).astype(jnp.float32)
    b2c = b2.reshape(Cout, 1).astype(jnp.float32)

    use_mxu_1x1 = Cmid >= 128
    if use_mxu_1x1:
        w2_prep = jnp.transpose(w2_io).astype(jnp.bfloat16)          # (Cout, Cmid)
        w2_spec = pl.BlockSpec((Cout, Cmid), lambda b: (0, 0))
    else:
        w2_prep = w2_io.reshape(Cmid, Cout, 1).astype(jnp.float32)   # (Cmid, Cout, 1), f32 VPU
        w2_spec = pl.BlockSpec((Cmid, Cout, 1), lambda b: (0, 0, 0))

    kernel = functools.partial(_fcn_head_kernel, H=H, W=W, NB=NB,
                               use_mxu_1x1=use_mxu_1x1)

    flops = 2 * N * HW * Cmid * 9 * Cin + 2 * N * HW * Cout * Cmid
    bytes_accessed = (2 * N * Cin * HW + 4 * N * Cout * HW
                      + 2 * 9 * Cmid * Cin + 4 * (Cmid + Cout) + 4 * Cmid * Cout)

    out_flat = pl.pallas_call(
        kernel,
        out_shape=jax.ShapeDtypeStruct((N, Cout, HW), jnp.float32),
        grid_spec=pltpu.PrefetchScalarGridSpec(
            num_scalar_prefetch=0,
            grid=(num_blocks,),
            in_specs=[
                pl.BlockSpec((NB, Cin, HW), lambda b: (b, 0, 0)),
                pl.BlockSpec((9, Cmid, Cin), lambda b: (0, 0, 0)),
                pl.BlockSpec((Cmid, 1), lambda b: (0, 0)),
                w2_spec,
                pl.BlockSpec((Cout, 1), lambda b: (0, 0)),
            ],
            out_specs=pl.BlockSpec((NB, Cout, HW), lambda b: (b, 0, 0)),
        ),
        compiler_params=pltpu.CompilerParams(
            dimension_semantics=("parallel",),
            vmem_limit_bytes=32 * 1024 * 1024),
        cost_estimate=pl.CostEstimate(flops=flops, transcendentals=0,
                                      bytes_accessed=bytes_accessed),
    )(x_flat, w1_folded, bnb, w2_prep, b2c)

    # (N, Cout, H*W) -> (N, Cout, H, W): contiguous reshape, no transpose / extra HBM pass.
    return out_flat.reshape(N, Cout, H, W)


def _reference_forward(x_nchw, w1_hwio, bn_gamma, bn_beta, bn_mean, bn_var,
                       w2_io, b2, *, eps=1e-5):
    """Pure-JAX f32 reference (lax conv, HIGHEST precision) for correctness checking."""
    w1_oihw = jnp.transpose(w1_hwio, (3, 2, 0, 1))
    y = jax.lax.conv_general_dilated(
        x_nchw, w1_oihw, window_strides=(1, 1), padding=((1, 1), (1, 1)),
        dimension_numbers=("NCHW", "OIHW", "NCHW"),
        precision=jax.lax.Precision.HIGHEST)
    scale = (bn_gamma / jnp.sqrt(bn_var + eps)).reshape(1, -1, 1, 1)
    bias = (bn_beta - bn_mean * bn_gamma / jnp.sqrt(bn_var + eps)).reshape(1, -1, 1, 1)
    y = jnp.maximum(y * scale + bias, 0.0)
    w2_oihw = jnp.transpose(w2_io, (1, 0)).reshape(w2_io.shape[1], w2_io.shape[0], 1, 1)
    y = jax.lax.conv_general_dilated(
        y, w2_oihw, window_strides=(1, 1), padding=((0, 0), (0, 0)),
        dimension_numbers=("NCHW", "OIHW", "NCHW"),
        precision=jax.lax.Precision.HIGHEST)
    return y + b2.reshape(1, -1, 1, 1)


if __name__ == "__main__":
    # Module config: _FCNHead(in_channels=16, channels=8) -> inter_channels = 4
    N, Cin, H, W = 2, 16, 16, 16
    Cmid = Cin // 4
    Cout = 8

    key = jax.random.PRNGKey(0)
    k_x, k_w1, k_g, k_b, k_m, k_v, k_w2, k_b2 = jax.random.split(key, 8)

    # Pre-round activations to bf16-representable values so the kernel's bf16 cast
    # is lossless and the comparison against the f32 reference stays tight.
    x = jax.random.normal(k_x, (N, Cin, H, W), dtype=jnp.float32)
    x = x.astype(jnp.bfloat16).astype(jnp.float32)

    w1 = jax.random.normal(k_w1, (3, 3, Cin, Cmid), dtype=jnp.float32) * 0.1   # HWIO
    bn_gamma = 1.0 + 0.1 * jax.random.normal(k_g, (Cmid,), dtype=jnp.float32)
    bn_beta = 0.1 * jax.random.normal(k_b, (Cmid,), dtype=jnp.float32)
    bn_mean = 0.1 * jax.random.normal(k_m, (Cmid,), dtype=jnp.float32)
    bn_var = jnp.abs(jax.random.normal(k_v, (Cmid,), dtype=jnp.float32)) + 0.5
    w2 = jax.random.normal(k_w2, (Cmid, Cout), dtype=jnp.float32) * 0.1        # IO
    b2 = 0.1 * jax.random.normal(k_b2, (Cout,), dtype=jnp.float32)

    fwd = jax.jit(fcn_head_forward)
    out = jax.block_until_ready(fwd(x, w1, bn_gamma, bn_beta, bn_mean, bn_var, w2, b2))

    ref = _reference_forward(x, w1, bn_gamma, bn_beta, bn_mean, bn_var, w2, b2)
    assert out.shape == (N, Cout, H, W)
    # bf16 MXU operands (BN-folded 3x3 weights are rounded to bf16) -> slightly
    # looser tolerance than a pure-f32 kernel; typical error here is <5e-3.
    assert jnp.allclose(out, ref, atol=2e-2, rtol=2e-2), "mismatch vs reference"

    print("KERNEL_OK")
</pallas_src>

<mosaic_0001>
module attributes {stable_mosaic.version = 11 : i64} {
  func.func @_fcn_head_kernel(%arg0: i32, %arg1: memref<1x16x256xbf16, #tpu.memory_space<vmem>>, %arg2: memref<9x4x16xbf16, #tpu.memory_space<vmem>>, %arg3: memref<4x1xf32, #tpu.memory_space<vmem>>, %arg4: memref<4x8x1xf32, #tpu.memory_space<vmem>>, %arg5: memref<8x1xf32, #tpu.memory_space<vmem>>, %arg6: memref<1x8x256xf32, #tpu.memory_space<vmem>>) attributes {dimension_semantics = [#tpu.dimension_semantics<parallel>], iteration_bounds = array<i64: 2>, scalar_prefetch = 0 : i64, scratch_operands = 0 : i64, tpu.core_type = #tpu.core_type<tc>, window_params = [{transform_indices = @transform_0, window_bounds = array<i64: 1, 16, 256>}, {pipeline_mode = #tpu.pipeline_mode<synchronous>, transform_indices = @transform_1, window_bounds = array<i64: 9, 4, 16>}, {pipeline_mode = #tpu.pipeline_mode<synchronous>, transform_indices = @transform_2, window_bounds = array<i64: 4, 1>}, {pipeline_mode = #tpu.pipeline_mode<synchronous>, transform_indices = @transform_3, window_bounds = array<i64: 4, 8, 1>}, {pipeline_mode = #tpu.pipeline_mode<synchronous>, transform_indices = @transform_4, window_bounds = array<i64: 8, 1>}, {transform_indices = @transform_5, window_bounds = array<i64: 1, 8, 256>}]} {
    %0 = tpu.iota {dimensions = array<i32: 1>} : vector<4x256xi32>
    %c15_i32 = arith.constant 15 : i32
    %1 = vector.broadcast %c15_i32 : i32 to vector<4x256xi32>
    %2 = arith.andi %0, %1 : vector<4x256xi32>
    %c4_i32 = arith.constant 4 : i32
    %3 = vector.broadcast %c4_i32 : i32 to vector<4x256xi32>
    %4 = arith.shrsi %0, %3 : vector<4x256xi32>
    %c1_i32 = arith.constant 1 : i32
    %5 = vector.broadcast %c1_i32 : i32 to vector<4x256xi32>
    %6 = arith.cmpi sge, %4, %5 : vector<4x256xi32>
    %c1_i32_0 = arith.constant 1 : i32
    %7 = vector.broadcast %c1_i32_0 : i32 to vector<4x256xi32>
    %8 = arith.cmpi sge, %2, %7 : vector<4x256xi32>
    %9 = arith.andi %6, %8 : vector<4x256xi1>
    %c1_i32_1 = arith.constant 1 : i32
    %10 = vector.broadcast %c1_i32_1 : i32 to vector<4x256xi32>
    %11 = arith.cmpi sge, %4, %10 : vector<4x256xi32>
    %c1_i32_2 = arith.constant 1 : i32
    %12 = vector.broadcast %c1_i32_2 : i32 to vector<4x256xi32>
    %13 = arith.cmpi sge, %4, %12 : vector<4x256xi32>
    %c15_i32_3 = arith.constant 15 : i32
    %14 = vector.broadcast %c15_i32_3 : i32 to vector<4x256xi32>
    %15 = arith.cmpi slt, %2, %14 : vector<4x256xi32>
    %16 = arith.andi %13, %15 : vector<4x256xi1>
    %c1_i32_4 = arith.constant 1 : i32
    %17 = vector.broadcast %c1_i32_4 : i32 to vector<4x256xi32>
    %18 = arith.cmpi sge, %2, %17 : vector<4x256xi32>
    %c15_i32_5 = arith.constant 15 : i32
    %19 = vector.broadcast %c15_i32_5 : i32 to vector<4x256xi32>
    %20 = arith.cmpi slt, %2, %19 : vector<4x256xi32>
    %c15_i32_6 = arith.constant 15 : i32
    %21 = vector.broadcast %c15_i32_6 : i32 to vector<4x256xi32>
    %22 = arith.cmpi slt, %4, %21 : vector<4x256xi32>
    %c1_i32_7 = arith.constant 1 : i32
    %23 = vector.broadcast %c1_i32_7 : i32 to vector<4x256xi32>
    %24 = arith.cmpi sge, %2, %23 : vector<4x256xi32>
    %25 = arith.andi %22, %24 : vector<4x256xi1>
    %c15_i32_8 = arith.constant 15 : i32
    %26 = vector.broadcast %c15_i32_8 : i32 to vector<4x256xi32>
    %27 = arith.cmpi slt, %4, %26 : vector<4x256xi32>
    %c15_i32_9 = arith.constant 15 : i32
    %28 = vector.broadcast %c15_i32_9 : i32 to vector<4x256xi32>
    %29 = arith.cmpi slt, %4, %28 : vector<4x256xi32>
    %c15_i32_10 = arith.constant 15 : i32
    %30 = vector.broadcast %c15_i32_10 : i32 to vector<4x256xi32>
    %31 = arith.cmpi slt, %2, %30 : vector<4x256xi32>
    %32 = arith.andi %29, %31 : vector<4x256xi1>
    %c0 = arith.constant 0 : index
    %c0_11 = arith.constant 0 : index
    %33 = vector.load %arg3[%c0, %c0_11] : memref<4x1xf32, #tpu.memory_space<vmem>>, vector<4x1xf32>
    %34 = vector.shape_cast %33 : vector<4x1xf32> to vector<4x1xf32>
    %35 = vector.broadcast %34 : vector<4x1xf32> to vector<4x256xf32>
    %c0_12 = arith.constant 0 : index
    %c0_13 = arith.constant 0 : index
    %36 = vector.load %arg5[%c0_12, %c0_13] : memref<8x1xf32, #tpu.memory_space<vmem>>, vector<8x1xf32>
    %37 = vector.shape_cast %36 : vector<8x1xf32> to vector<8x1xf32>
    %38 = vector.broadcast %37 : vector<8x1xf32> to vector<8x256xf32>
    %c0_14 = arith.constant 0 : index
    %c0_15 = arith.constant 0 : index
    %c0_16 = arith.constant 0 : index
    %39 = vector.load %arg1[%c0_14, %c0_15, %c0_16] : memref<1x16x256xbf16, #tpu.memory_space<vmem>>, vector<1x16x256xbf16>
    %40 = vector.shape_cast %39 : vector<1x16x256xbf16> to vector<16x256xbf16>
    %41 = arith.extf %40 : vector<16x256xbf16> to vector<16x256xf32>
    %c17_i32 = arith.constant 17 : i32
    %42 = tpu.dynamic_rotate %41 by %c17_i32 dim 1 : vector<16x256xf32>, i32 -> vector<16x256xf32>
    %c0_17 = arith.constant 0 : index
    %c0_18 = arith.constant 0 : index
    %c0_19 = arith.constant 0 : index
    %43 = vector.load %arg2[%c0_17, %c0_18, %c0_19] : memref<9x4x16xbf16, #tpu.memory_space<vmem>>, vector<1x4x16xbf16>
    %44 = vector.shape_cast %43 : vector<1x4x16xbf16> to vector<4x16xbf16>
    %45 = arith.truncf %42 : vector<16x256xf32> to vector<16x256xbf16>
    %cst = arith.constant dense<0.000000e+00> : vector<4x256xf32>
    %46 = tpu.matmul %44, %45, %cst {dimension_numbers = #tpu.dot_dimension_numbers<[1], [0], [0], [1], [0, 0, 1, 1], [], []>} : vector<4x16xbf16>, vector<16x256xbf16>, vector<4x256xf32> -> vector<4x256xf32>
    %cst_20 = arith.constant 0.000000e+00 : f32
    %47 = vector.broadcast %cst_20 : f32 to vector<4x256xf32>
    %48 = arith.select %9, %46, %47 : vector<4x256xi1>, vector<4x256xf32>
    %49 = arith.addf %35, %48 : vector<4x256xf32>
    %c16_i32 = arith.constant 16 : i32
    %50 = tpu.dynamic_rotate %41 by %c16_i32 dim 1 : vector<16x256xf32>, i32 -> vector<16x256xf32>
    %c1 = arith.constant 1 : index
    %c0_21 = arith.constant 0 : index
    %c0_22 = arith.constant 0 : index
    %51 = vector.load %arg2[%c1, %c0_21, %c0_22] : memref<9x4x16xbf16, #tpu.memory_space<vmem>>, vector<1x4x16xbf16>
    %52 = vector.shape_cast %51 : vector<1x4x16xbf16> to vector<4x16xbf16>
    %53 = arith.truncf %50 : vector<16x256xf32> to vector<16x256xbf16>
    %cst_23 = arith.constant dense<0.000000e+00> : vector<4x256xf32>
    %54 = tpu.matmul %52, %53, %cst_23 {dimension_numbers = #tpu.dot_dimension_numbers<[1], [0], [0], [1], [0, 0, 1, 1], [], []>} : vector<4x16xbf16>, vector<16x256xbf16>, vector<4x256xf32> -> vector<4x256xf32>
    %cst_24 = arith.constant 0.000000e+00 : f32
    %55 = vector.broadcast %cst_24 : f32 to vector<4x256xf32>
    %56 = arith.select %11, %54, %55 : vector<4x256xi1>, vector<4x256xf32>
    %57 = arith.addf %49, %56 : vector<4x256xf32>
    %c15_i32_25 = arith.constant 15 : i32
    %58 = tpu.dynamic_rotate %41 by %c15_i32_25 dim 1 : vector<16x256xf32>, i32 -> vector<16x256xf32>
    %c2 = arith.constant 2 : index
    %c0_26 = arith.constant 0 : index
    %c0_27 = arith.constant 0 : index
    %59 = vector.load %arg2[%c2, %c0_26, %c0_27] : memref<9x4x16xbf16, #tpu.memory_space<vmem>>, vector<1x4x16xbf16>
    %60 = vector.shape_cast %59 : vector<1x4x16xbf16> to vector<4x16xbf16>
    %61 = arith.truncf %58 : vector<16x256xf32> to vector<16x256xbf16>
    %cst_28 = arith.constant dense<0.000000e+00> : vector<4x256xf32>
    %62 = tpu.matmul %60, %61, %cst_28 {dimension_numbers = #tpu.dot_dimension_numbers<[1], [0], [0], [1], [0, 0, 1, 1], [], []>} : vector<4x16xbf16>, vector<16x256xbf16>, vector<4x256xf32> -> vector<4x256xf32>
    %cst_29 = arith.constant 0.000000e+00 : f32
    %63 = vector.broadcast %cst_29 : f32 to vector<4x256xf32>
    %64 = arith.select %16, %62, %63 : vector<4x256xi1>, vector<4x256xf32>
    %65 = arith.addf %57, %64 : vector<4x256xf32>
    %c1_i32_30 = arith.constant 1 : i32
    %66 = tpu.dynamic_rotate %41 by %c1_i32_30 dim 1 : vector<16x256xf32>, i32 -> vector<16x256xf32>
    %c3 = arith.constant 3 : index
    %c0_31 = arith.constant 0 : index
    %c0_32 = arith.constant 0 : index
    %67 = vector.load %arg2[%c3, %c0_31, %c0_32] : memref<9x4x16xbf16, #tpu.memory_space<vmem>>, vector<1x4x16xbf16>
    %68 = vector.shape_cast %67 : vector<1x4x16xbf16> to vector<4x16xbf16>
    %69 = arith.truncf %66 : vector<16x256xf32> to vector<16x256xbf16>
    %cst_33 = arith.constant dense<0.000000e+00> : vector<4x256xf32>
    %70 = tpu.matmul %68, %69, %cst_33 {dimension_numbers = #tpu.dot_dimension_numbers<[1], [0], [0], [1], [0, 0, 1, 1], [], []>} : vector<4x16xbf16>, vector<16x256xbf16>, vector<4x256xf32> -> vector<4x256xf32>
    %cst_34 = arith.constant 0.000000e+00 : f32
    %71 = vector.broadcast %cst_34 : f32 to vector<4x256xf32>
    %72 = arith.select %18, %70, %71 : vector<4x256xi1>, vector<4x256xf32>
    %73 = arith.addf %65, %72 : vector<4x256xf32>
    %c4 = arith.constant 4 : index
    %c0_35 = arith.constant 0 : index
    %c0_36 = arith.constant 0 : index
    %74 = vector.load %arg2[%c4, %c0_35, %c0_36] : memref<9x4x16xbf16, #tpu.memory_space<vmem>>, vector<1x4x16xbf16>
    %75 = vector.shape_cast %74 : vector<1x4x16xbf16> to vector<4x16xbf16>
    %76 = arith.truncf %41 : vector<16x256xf32> to vector<16x256xbf16>
    %cst_37 = arith.constant dense<0.000000e+00> : vector<4x256xf32>
    %77 = tpu.matmul %75, %76, %cst_37 {dimension_numbers = #tpu.dot_dimension_numbers<[1], [0], [0], [1], [0, 0, 1, 1], [], []>} : vector<4x16xbf16>, vector<16x256xbf16>, vector<4x256xf32> -> vector<4x256xf32>
    %78 = arith.addf %73, %77 : vector<4x256xf32>
    %c255_i32 = arith.constant 255 : i32
    %79 = tpu.dynamic_rotate %41 by %c255_i32 dim 1 : vector<16x256xf32>, i32 -> vector<16x256xf32>
    %c5 = arith.constant 5 : index
    %c0_38 = arith.constant 0 : index
    %c0_39 = arith.constant 0 : index
    %80 = vector.load %arg2[%c5, %c0_38, %c0_39] : memref<9x4x16xbf16, #tpu.memory_space<vmem>>, vector<1x4x16xbf16>
    %81 = vector.shape_cast %80 : vector<1x4x16xbf16> to vector<4x16xbf16>
    %82 = arith.truncf %79 : vector<16x256xf32> to vector<16x256xbf16>
    %cst_40 = arith.constant dense<0.000000e+00> : vector<4x256xf32>
    %83 = tpu.matmul %81, %82, %cst_40 {dimension_numbers = #tpu.dot_dimension_numbers<[1], [0], [0], [1], [0, 0, 1, 1], [], []>} : vector<4x16xbf16>, vector<16x256xbf16>, vector<4x256xf32> -> vector<4x256xf32>
    %cst_41 = arith.constant 0.000000e+00 : f32
    %84 = vector.broadcast %cst_41 : f32 to vector<4x256xf32>
    %85 = arith.select %20, %83, %84 : vector<4x256xi1>, vector<4x256xf32>
    %86 = arith.addf %78, %85 : vector<4x256xf32>
    %c241_i32 = arith.constant 241 : i32
    %87 = tpu.dynamic_rotate %41 by %c241_i32 dim 1 : vector<16x256xf32>, i32 -> vector<16x256xf32>
    %c6 = arith.constant 6 : index
    %c0_42 = arith.constant 0 : index
    %c0_43 = arith.constant 0 : index
    %88 = vector.load %arg2[%c6, %c0_42, %c0_43] : memref<9x4x16xbf16, #tpu.memory_space<vmem>>, vector<1x4x16xbf16>
    %89 = vector.shape_cast %88 : vector<1x4x16xbf16> to vector<4x16xbf16>
    %90 = arith.truncf %87 : vector<16x256xf32> to vector<16x256xbf16>
    %cst_44 = arith.constant dense<0.000000e+00> : vector<4x256xf32>
    %91 = tpu.matmul %89, %90, %cst_44 {dimension_numbers = #tpu.dot_dimension_numbers<[1], [0], [0], [1], [0, 0, 1, 1], [], []>} : vector<4x16xbf16>, vector<16x256xbf16>, vector<4x256xf32> -> vector<4x256xf32>
    %cst_45 = arith.constant 0.000000e+00 : f32
    %92 = vector.broadcast %cst_45 : f32 to vector<4x256xf32>
    %93 = arith.select %25, %91, %92 : vector<4x256xi1>, vector<4x256xf32>
    %94 = arith.addf %86, %93 : vector<4x256xf32>
    %c240_i32 = arith.constant 240 : i32
    %95 = tpu.dynamic_rotate %41 by %c240_i32 dim 1 : vector<16x256xf32>, i32 -> vector<16x256xf32>
    %c7 = arith.constant 7 : index
    %c0_46 = arith.constant 0 : index
    %c0_47 = arith.constant 0 : index
    %96 = vector.load %arg2[%c7, %c0_46, %c0_47] : memref<9x4x16xbf16, #tpu.memory_space<vmem>>, vector<1x4x16xbf16>
    %97 = vector.shape_cast %96 : vector<1x4x16xbf16> to vector<4x16xbf16>
    %98 = arith.truncf %95 : vector<16x256xf32> to vector<16x256xbf16>
    %cst_48 = arith.constant dense<0.000000e+00> : vector<4x256xf32>
    %99 = tpu.matmul %97, %98, %cst_48 {dimension_numbers = #tpu.dot_dimension_numbers<[1], [0], [0], [1], [0, 0, 1, 1], [], []>} : vector<4x16xbf16>, vector<16x256xbf16>, vector<4x256xf32> -> vector<4x256xf32>
    %cst_49 = arith.constant 0.000000e+00 : f32
    %100 = vector.broadcast %cst_49 : f32 to vector<4x256xf32>
    %101 = arith.select %27, %99, %100 : vector<4x256xi1>, vector<4x256xf32>
    %102 = arith.addf %94, %101 : vector<4x256xf32>
    %c239_i32 = arith.constant 239 : i32
    %103 = tpu.dynamic_rotate %41 by %c239_i32 dim 1 : vector<16x256xf32>, i32 -> vector<16x256xf32>
    %c8 = arith.constant 8 : index
    %c0_50 = arith.constant 0 : index
    %c0_51 = arith.constant 0 : index
    %104 = vector.load %arg2[%c8, %c0_50, %c0_51] : memref<9x4x16xbf16, #tpu.memory_space<vmem>>, vector<1x4x16xbf16>
    %105 = vector.shape_cast %104 : vector<1x4x16xbf16> to vector<4x16xbf16>
    %106 = arith.truncf %103 : vector<16x256xf32> to vector<16x256xbf16>
    %cst_52 = arith.constant dense<0.000000e+00> : vector<4x256xf32>
    %107 = tpu.matmul %105, %106, %cst_52 {dimension_numbers = #tpu.dot_dimension_numbers<[1], [0], [0], [1], [0, 0, 1, 1], [], []>} : vector<4x16xbf16>, vector<16x256xbf16>, vector<4x256xf32> -> vector<4x256xf32>
    %cst_53 = arith.constant 0.000000e+00 : f32
    %108 = vector.broadcast %cst_53 : f32 to vector<4x256xf32>
    %109 = arith.select %32, %107, %108 : vector<4x256xi1>, vector<4x256xf32>
    %110 = arith.addf %102, %109 : vector<4x256xf32>
    %cst_54 = arith.constant 0.000000e+00 : f32
    %111 = vector.broadcast %cst_54 : f32 to vector<4x256xf32>
    %112 = arith.maximumf %110, %111 : vector<4x256xf32>
    %c0_55 = arith.constant 0 : index
    %c0_56 = arith.constant 0 : index
    %c0_57 = arith.constant 0 : index
    %113 = vector.load %arg4[%c0_55, %c0_56, %c0_57] : memref<4x8x1xf32, #tpu.memory_space<vmem>>, vector<1x8x1xf32>
    %114 = vector.shape_cast %113 : vector<1x8x1xf32> to vector<8x1xf32>
    %115 = vector.extract_strided_slice %112 {offsets = [0, 0], sizes = [1, 256], strides = [1, 1]} : vector<4x256xf32> to vector<1x256xf32>
    %116 = vector.broadcast %114 : vector<8x1xf32> to vector<8x256xf32>
    %117 = vector.broadcast %115 : vector<1x256xf32> to vector<8x256xf32>
    %118 = arith.mulf %116, %117 : vector<8x256xf32>
    %119 = arith.addf %38, %118 : vector<8x256xf32>
    %c1_58 = arith.constant 1 : index
    %c0_59 = arith.constant 0 : index
    %c0_60 = arith.constant 0 : index
    %120 = vector.load %arg4[%c1_58, %c0_59, %c0_60] : memref<4x8x1xf32, #tpu.memory_space<vmem>>, vector<1x8x1xf32>
    %121 = vector.shape_cast %120 : vector<1x8x1xf32> to vector<8x1xf32>
    %122 = vector.extract_strided_slice %112 {offsets = [1, 0], sizes = [1, 256], strides = [1, 1]} : vector<4x256xf32> to vector<1x256xf32>
    %123 = vector.broadcast %121 : vector<8x1xf32> to vector<8x256xf32>
    %124 = vector.broadcast %122 : vector<1x256xf32> to vector<8x256xf32>
    %125 = arith.mulf %123, %124 : vector<8x256xf32>
    %126 = arith.addf %119, %125 : vector<8x256xf32>
    %c2_61 = arith.constant 2 : index
    %c0_62 = arith.constant 0 : index
    %c0_63 = arith.constant 0 : index
    %127 = vector.load %arg4[%c2_61, %c0_62, %c0_63] : memref<4x8x1xf32, #tpu.memory_space<vmem>>, vector<1x8x1xf32>
    %128 = vector.shape_cast %127 : vector<1x8x1xf32> to vector<8x1xf32>
    %129 = vector.extract_strided_slice %112 {offsets = [2, 0], sizes = [1, 256], strides = [1, 1]} : vector<4x256xf32> to vector<1x256xf32>
    %130 = vector.broadcast %128 : vector<8x1xf32> to vector<8x256xf32>
    %131 = vector.broadcast %129 : vector<1x256xf32> to vector<8x256xf32>
    %132 = arith.mulf %130, %131 : vector<8x256xf32>
    %133 = arith.addf %126, %132 : vector<8x256xf32>
    %c3_64 = arith.constant 3 : index
    %c0_65 = arith.constant 0 : index
    %c0_66 = arith.constant 0 : index
    %134 = vector.load %arg4[%c3_64, %c0_65, %c0_66] : memref<4x8x1xf32, #tpu.memory_space<vmem>>, vector<1x8x1xf32>
    %135 = vector.shape_cast %134 : vector<1x8x1xf32> to vector<8x1xf32>
    %136 = vector.extract_strided_slice %112 {offsets = [3, 0], sizes = [1, 256], strides = [1, 1]} : vector<4x256xf32> to vector<1x256xf32>
    %137 = vector.broadcast %135 : vector<8x1xf32> to vector<8x256xf32>
    %138 = vector.broadcast %136 : vector<1x256xf32> to vector<8x256xf32>
    %139 = arith.mulf %137, %138 : vector<8x256xf32>
    %140 = arith.addf %133, %139 : vector<8x256xf32>
    %c0_67 = arith.constant 0 : index
    %c0_68 = arith.constant 0 : index
    %c0_69 = arith.constant 0 : index
    %141 = vector.load %arg6[%c0_67, %c0_68, %c0_69] : memref<1x8x256xf32, #tpu.memory_space<vmem>>, vector<1x8x256xf32>
    %142 = vector.shape_cast %141 : vector<1x8x256xf32> to vector<8x256xf32>
    %143 = vector.shape_cast %140 : vector<8x256xf32> to vector<1x8x256xf32>
    tpu.vector_store %arg6[%c0_67, %c0_68, %c0_69], %143 {strides = array<i32>} : memref<1x8x256xf32, #tpu.memory_space<vmem>>, vector<1x8x256xf32>,
    return
  }
  func.func @transform_0(%arg0: i32) -> (i32, i32, i32) {
    %c0_i32 = arith.constant 0 : i32
    %c0_i32_0 = arith.constant 0 : i32
    %c0_i32_1 = arith.constant 0 : i32
    return %arg0, %c0_i32, %c0_i32_0 : i32, i32, i32
  }
  func.func @transform_1(%arg0: i32) -> (i32, i32, i32) {
    %c0_i32 = arith.constant 0 : i32
    %c0_i32_0 = arith.constant 0 : i32
    %c0_i32_1 = arith.constant 0 : i32
    %c0_i32_2 = arith.constant 0 : i32
    return %c0_i32, %c0_i32_0, %c0_i32_1 : i32, i32, i32
  }
  func.func @transform_2(%arg0: i32) -> (i32, i32) {
    %c0_i32 = arith.constant 0 : i32
    %c0_i32_0 = arith.constant 0 : i32
    %c0_i32_1 = arith.constant 0 : i32
    return %c0_i32, %c0_i32_0 : i32, i32
  }
  func.func @transform_3(%arg0: i32) -> (i32, i32, i32) {
    %c0_i32 = arith.constant 0 : i32
    %c0_i32_0 = arith.constant 0 : i32
    %c0_i32_1 = arith.constant 0 : i32
    %c0_i32_2 = arith.constant 0 : i32
    return %c0_i32, %c0_i32_0, %c0_i32_1 : i32, i32, i32
  }
  func.func @transform_4(%arg0: i32) -> (i32, i32) {
    %c0_i32 = arith.constant 0 : i32
    %c0_i32_0 = arith.constant 0 : i32
    %c0_i32_1 = arith.constant 0 : i32
    return %c0_i32, %c0_i32_0 : i32, i32
  }
  func.func @transform_5(%arg0: i32) -> (i32, i32, i32) {
    %c0_i32 = arith.constant 0 : i32
    %c0_i32_0 = arith.constant 0 : i32
    %c0_i32_1 = arith.constant 0 : i32
    return %arg0, %c0_i32, %c0_i32_0 : i32, i32, i32
  }
}

</mosaic_0001>

<bundles_post_ra>
// kernel: fcn_head_forward.1
= control target key start
LH: loop header
LB: loop body
LE: loop exit
PB: predicated region body
PF: predicated region fallthrough
CT: control target
= control target key end

     0   :  { %s1162_s18 = smov 0   ;;  %s1416_s0 = inlined_call_operand.vmem [shape: bf16[2,16,256], index: 0, kind: input, shape index: {}]   ;;  %s1417_s1 = inlined_call_operand.vmem [shape: bf16[9,4,16], index: 1, kind: input, shape index: {}]   ;;  %s1418_s2 = inlined_call_operand.vmem [shape: f32[4,1], index: 2, kind: input, shape index: {}]   ;;  %s1419_s3 = inlined_call_operand.vmem [shape: f32[4,8,1], index: 3, kind: input, shape index: {}]   ;;  %s1420_s4 = inlined_call_operand.vmem [shape: f32[8,1], index: 4, kind: input, shape index: {}]   ;;  %s1421_s5 = inlined_call_operand.vmem [shape: f32[2,8,256], index: 5, kind: output, shape index: {}]  }
   0x1 LB: > { %s979_s19 = sadd.s32 4294967295, %s1121_s18   ;;  %p983_p0 = scmp.ge.s32.totalorder %s1121_s18, 1  ;;  %s1121_s18 = sphi %s1162_s18, %s15_s18  }
   0x2   : > { %p187_p1 = scmp.lt.s32.totalorder %s1121_s18, 3 }
   0x4   : > { %p188_p2 = pnand %p983_p0, %p187_p1 }
   0x5   : > { %p215_p3 = scmp.lt.s32.totalorder (!%p188_p2), %s979_s19, 1  ;;  %s1123_s24 = smov (!%p188_p2), 16   ;;  %v1125_v8 = vmov (!%p188_p2), 0   ;;  %v249_v11 = vld [vmem:[%s1418_s2] sm:$0xf] (!%p188_p2)  ;;  %v1007_v13 = vld [vmem:[%s1419_s3 + $0x8] sm:$0xff] (!%p188_p2)  ;;  %v226_v17 = vlaneseq (!%p188_p2) }
   0x6   : > { %191 = sbr.rel (%p188_p2) target bundleno = 413 (0x19d), region = 40  ;;  %s1124_s25 = smov (!%p188_p2), 17   ;;  %319 = vmatprep.mubr.bf16.mxu0 (!%p188_p2), %v1125_v8  ;;  %384 = vmatprep.mubr.bf16.mxu1 (!%p188_p2), %v1125_v8  ;;  %v847_v12 = vld [vmem:[%s1419_s3] sm:$0xff] (!%p188_p2)  ;;  %v1009_v15 = vld [vmem:[%s1419_s3 + $0x18] sm:$0xff] (!%p188_p2)  ;;  %v1008_v16 = vld [vmem:[%s1419_s3 + $0x10] sm:$0xff] (!%p188_p2)  ;;  %vm283_vm4 = vcmask (!%p188_p2), 130048  }
   0x7   : > { %1111 = vset.pattern.permute.xlu0 (!%p188_p2), %v1125_v8  ;;  %1112 = vset.pattern.permute.xlu1 (!%p188_p2), %v1125_v8  ;;  %s1126_s26 = smov (!%p188_p2), 15   ;;  %s1127_s27 = smov (!%p188_p2), 1   ;;  %v255_v14 = vld [vmem:[%s1420_s4] sm:$0xff] (!%p188_p2)  ;;  %v1213_v20 = vand.u32 (!%p188_p2), 127, %v226_v17 }
   0x8   : > { %s1128_s28 = smov (!%p188_p2), 127   ;;  %s1129_s29 = smov (!%p188_p2), 113   ;;  %v280_v55 = vld [vmem:[%s1417_s1] sm:$0x3] (!%p188_p2)  ;;  %v989_v61 = vld [vmem:[%s1417_s1 + $0x2] sm:$0x3] (!%p188_p2) }
   0x9   : > { %s1130_s30 = smov (!%p188_p2), 112   ;;  %s1131_s6 = smov (!%p188_p2), 111   ;;  %vm275_vm0 = vcmp.lt.s32.totalorder (!%p188_p2), %v1213_v20, 17  ;;  %vm340_vm1 = vcmp.lt.s32.totalorder (!%p188_p2), %v1213_v20, 16  ;;  %vm405_vm2 = vcmp.lt.s32.totalorder (!%p188_p2), %v1213_v20, 15  ;;  %vm470_vm3 = vcmp.lt.s32.totalorder (!%p188_p2), %v1213_v20, 1 }
   0xa   : > { %vm593_vm5 = vcmp.lt.s32.totalorder (!%p188_p2), %v1213_v20, 127  ;;  %vm658_vm6 = vcmp.lt.s32.totalorder (!%p188_p2), %v1213_v20, 113  ;;  %vm723_vm7 = vcmp.lt.s32.totalorder (!%p188_p2), %v1213_v20, 112  ;;  %vm788_vm8 = vcmp.lt.s32.totalorder (!%p188_p2), %v1213_v20, 111 }
   0xd   : > { %s1439_s19 = smov (!%p215_p3, %s979_s19), 1 }
   0xe   : > { %s1012_s20 = sshll.u32 %s1439_s19, 4 }
   0xf   : > { %s219_s23 = scalar_lea.vmem %s1416_s0, %s1012_s20  ;;  %s224_s17 = scalar_lea.vmem %s1421_s5, %s1012_s20 }
  0x10   : > { %v1178_v0 = vld [vmem:[%s219_s23] sm:$0xff]  ;;  %v1180_v1 = vld [vmem:[%s219_s23 + $0x8] sm:$0xff] }
  0x11   : > { %v263_v2 = vunpack.c.l.bf16 %v1178_v0  ;;  %v265_v3 = vunpack.c.l.bf16 %v1180_v1  ;;  %v264_v4 = vunpack.c.h.bf16 %v1178_v0  ;;  %v266_v5 = vunpack.c.h.bf16 %v1180_v1 }
  0x12   : > { %v997_v9 = vcombine.high %v1178_v0, %v1180_v1  ;;  %v996_v10 = vcombine.low %v1178_v0, %v1180_v1 }
  0x13   : > { %v1041_v6 = vpack.i.bf16 %v265_v3, %v263_v2  ;;  %v1046_v7 = vpack.i.bf16 %v266_v5, %v264_v4 }
  0x15   : > { %1042 = vrot.lane.b32.xlu1 %v1041_v6, %s1123_s24  ;;  %1032 = vrot.lane.b32.xlu0 %v1041_v6, %s1124_s25 }
  0x19   : > { %1047 = vrot.lane.b32.xlu1 %v1046_v7, %s1123_s24  ;;  %1037 = vrot.lane.b32.xlu0 %v1046_v7, %s1124_s25 }
  0x1d   : > { %1057 = vrot.lane.b32.xlu1 %v1046_v7, %s1126_s26  ;;  %1052 = vrot.lane.b32.xlu0 %v1041_v6, %s1126_s26 }
  0x21   : > { %1067 = vrot.lane.b32.xlu1 %v1046_v7, %s1127_s27  ;;  %1062 = vrot.lane.b32.xlu0 %v1041_v6, %s1127_s27 }
  0x25   : > { %1077 = vrot.lane.b32.xlu1 %v1046_v7, %s1128_s28  ;;  %1072 = vrot.lane.b32.xlu0 %v1041_v6, %s1128_s28 }
  0x29   : > { %1087 = vrot.lane.b32.xlu1 %v1046_v7, %s1129_s29  ;;  %1082 = vrot.lane.b32.xlu0 %v1041_v6, %s1129_s29 }
  0x2d   : > { %1097 = vrot.lane.b32.xlu1 %v1046_v7, %s1130_s30  ;;  %1092 = vrot.lane.b32.xlu0 %v1041_v6, %s1130_s30 }
  0x31   : > { %1107 = vrot.lane.b32.xlu1 %v1046_v7, %s1131_s6  ;;  %1102 = vrot.lane.b32.xlu0 %v1041_v6, %s1131_s6 }
  0x35   : > { %252 = vperm.xlu0 %1111, %v249_v11   ;;  %850 = vperm.xlu1 %1112, %v847_v12  }
  0x39   : > { %869 = vperm.xlu0 %1111, %v1007_v13   ;;  %258 = vperm.xlu1 %1112, %v255_v14  }
  0x3d   : > { %907 = vperm.xlu0 %1111, %v1009_v15   ;;  %888 = vperm.xlu1 %1112, %v1008_v16  }
  0x87   : > { %v1043_v18 = vpop.permute.xlu1 %1042  ;;  %v1033_v19 = vpop.permute.xlu0 %1032 }
  0x88   : > { %v1045_v21 = vunpack.i.h.bf16 %v1043_v18  ;;  %v1044_v22 = vunpack.i.l.bf16 %v1043_v18  ;;  %v1035_v23 = vunpack.i.h.bf16 %v1033_v19  ;;  %v1034_v24 = vunpack.i.l.bf16 %v1033_v19 }
  0x8b   : > { %v1048_v25 = vpop.permute.xlu1 %1047  ;;  %v1038_v26 = vpop.permute.xlu0 %1037 }
  0x8c   : > { %v1050_v27 = vunpack.i.h.bf16 %v1048_v25  ;;  %v1049_v28 = vunpack.i.l.bf16 %v1048_v25  ;;  %v1040_v29 = vunpack.i.h.bf16 %v1038_v26  ;;  %v1039_v30 = vunpack.i.l.bf16 %v1038_v26 }
  0x8e   : > { %v276_v31 = vsel %vm275_vm0, %v1034_v24, %v1039_v30  ;;  %v277_v32 = vsel %vm275_vm0, %v1035_v23, %v1040_v29  ;;  %v341_v33 = vsel %vm340_vm1, %v1044_v22, %v1049_v28  ;;  %v342_v34 = vsel %vm340_vm1, %v1045_v21, %v1050_v27 }
  0x8f   : > { %v1058_v35 = vpop.permute.xlu1 %1057  ;;  %v1053_v36 = vpop.permute.xlu0 %1052  ;;  %v282_v37 = vpack.c.bf16 %v277_v32, %v276_v31  ;;  %v348_v38 = vpack.c.bf16 %v342_v34, %v341_v33  ;;  %v278_v39 = vsel %vm275_vm0, %v1039_v30, %v1034_v24  ;;  %v279_v40 = vsel %vm275_vm0, %v1040_v29, %v1035_v23 }
  0x90   : > { %v1060_v41 = vunpack.i.h.bf16 %v1058_v35  ;;  %v1059_v42 = vunpack.i.l.bf16 %v1058_v35  ;;  %v1055_v43 = vunpack.i.h.bf16 %v1053_v36  ;;  %v1054_v44 = vunpack.i.l.bf16 %v1053_v36 }
  0x91   : > { %287 = vmatprep.subr.bf16.mxu0 %v282_v37  ;;  %352 = vmatprep.subr.bf16.mxu1 %v348_v38  ;;  %v281_v45 = vpack.c.bf16 %v279_v40, %v278_v39  ;;  %v343_v46 = vsel %vm340_vm1, %v1049_v28, %v1044_v22  ;;  %v344_v47 = vsel %vm340_vm1, %v1050_v27, %v1045_v21  ;;  %v991_v21 = vld [vmem:[%s1417_s1 + $0x4] sm:$0x3] }
  0x92   : > { %v409_v48 = vsel %vm405_vm2, %v1060_v41, %v1055_v43  ;;  %v408_v49 = vsel %vm405_vm2, %v1059_v42, %v1054_v44  ;;  %v347_v50 = vpack.c.bf16 %v344_v47, %v343_v46  ;;  %v406_v51 = vsel %vm405_vm2, %v1054_v44, %v1059_v42 }
  0x93   : > { %v412_v52 = vpack.c.bf16 %v409_v48, %v408_v49  ;;  %288 = vmatpush1.bf16.msra.mxu0 %v281_v45  ;;  %v1068_v53 = vpop.permute.xlu1 %1067  ;;  %v1063_v54 = vpop.permute.xlu0 %1062  ;;  %v407_v56 = vsel %vm405_vm2, %v1055_v43, %v1060_v41  ;;  %v995_v45 = vld [vmem:[%s1417_s1 + $0x8] sm:$0x3] }
  0x94   : > { %353 = vmatpush1.bf16.msra.mxu1 %v347_v50  ;;  %v1070_v57 = vunpack.i.h.bf16 %v1068_v53  ;;  %v1069_v58 = vunpack.i.l.bf16 %v1068_v53  ;;  %v1065_v59 = vunpack.i.h.bf16 %v1063_v54  ;;  %v1064_v60 = vunpack.i.l.bf16 %v1063_v54  ;;  %v999_v53 = vld [vmem:[%s1417_s1 + $0xa] sm:$0x3] }
  0x95   : > { %v413_v62 = vpack.c.bf16 %v407_v56, %v406_v51 }
  0x96   : > { %v474_v63 = vsel %vm470_vm3, %v1070_v57, %v1065_v59  ;;  %v473_v2 = vsel %vm470_vm3, %v1069_v58, %v1064_v60  ;;  %988 = vmatmul.mubr.msk.bf16.vlgmr.msra.gmra.mrb[0].mxu0 %vm283_vm4, %v280_v55  ;;  %v471_v3 = vsel %vm470_vm3, %v1064_v60, %v1069_v58  ;;  %v472_v4 = vsel %vm470_vm3, %v1065_v59, %v1070_v57  ;;  %v1001_v60 = vld [vmem:[%s1417_s1 + $0xc] sm:$0x3] }
  0x97   : > { %v477_v5 = vpack.c.bf16 %v474_v63, %v473_v2  ;;  %417 = vmatprep.subr.bf16.mxu0 %v413_v62  ;;  %990 = vmatmul.mubr.msk.bf16.vlgmr.msra.gmra.mrb[0].mxu1 %vm283_vm4, %v989_v61  ;;  %v1078_v6 = vpop.permute.xlu1 %1077  ;;  %v1073_v7 = vpop.permute.xlu0 %1072  ;;  %v478_v11 = vpack.c.bf16 %v472_v4, %v471_v3  ;;  %v1003_v61 = vld [vmem:[%s1417_s1 + $0xe] sm:$0x3]  ;;  %v1005_v62 = vld [vmem:[%s1417_s1 + $0x10] sm:$0x3]  ;;  %v1321_v63 = vadd.s32 128, %v1213_v20  ;;  %v229_v2 = vand.u32 15, %v1213_v20 }
  0x98   : > { %418 = vmatpush1.bf16.msra.mxu0 %v412_v52  ;;  %v1080_v12 = vunpack.i.h.bf16 %v1078_v6  ;;  %v1079_v13 = vunpack.i.l.bf16 %v1078_v6  ;;  %v1075_v14 = vunpack.i.h.bf16 %v1073_v7  ;;  %v1074_v15 = vunpack.i.l.bf16 %v1073_v7  ;;  %449 = vmatprep.mubr.bf16.mxu0 %v1125_v8 }
  0x99   : > { %482 = vmatprep.subr.bf16.mxu1 %v478_v11  ;;  %514 = vmatprep.mubr.bf16.mxu1 %v1125_v8  ;;  %v231_v3 = vshra.s32 %v1213_v20, 4  ;;  %v230_v4 = vand.u32 15, %v1321_v63  ;;  %vm1331_vm10 = vcmp.ge.s32.totalorder %v229_v2, 1  ;;  %vm1355_vm15 = vcmp.lt.s32.totalorder %v229_v2, 15 }
  0x9a   : > { %v595_v16 = vsel %vm593_vm5, %v1075_v14, %v1080_v12  ;;  %v594_v18 = vsel %vm593_vm5, %v1074_v15, %v1079_v13  ;;  %483 = vmatpush1.bf16.msra.mxu1 %v477_v5  ;;  %542 = vmatprep.subr.bf16.mxu0 %v997_v9  ;;  %v596_v19 = vsel %vm593_vm5, %v1079_v13, %v1074_v15  ;;  %v993_v9 = vld [vmem:[%s1417_s1 + $0x6] sm:$0x3]  ;;  %v232_v5 = vshra.s32 %v1321_v63, 4 }
  0x9b   : > { %v1088_v22 = vpop.permute.xlu1 %1087  ;;  %v1083_v23 = vpop.permute.xlu0 %1082  ;;  %v597_v24 = vsel %vm593_vm5, %v1080_v12, %v1075_v14  ;;  %v600_v29 = vpack.c.bf16 %v595_v16, %v594_v18  ;;  %vm1327_vm9 = vcmp.ge.s32.totalorder %v231_v3, 1  ;;  %vm1339_vm12 = vcmp.ge.s32.totalorder %v230_v4, 1 }
  0x9c   : > { %v1090_v25 = vunpack.i.h.bf16 %v1088_v22  ;;  %v1089_v26 = vunpack.i.l.bf16 %v1088_v22  ;;  %v1085_v27 = vunpack.i.h.bf16 %v1083_v23  ;;  %v1084_v28 = vunpack.i.l.bf16 %v1083_v23  ;;  %vm237_vm13 = vmand %vm1327_vm9, %vm1331_vm10 }
  0x9d   : > { %v601_v30 = vpack.c.bf16 %v597_v24, %v596_v19  ;;  %vm1335_vm11 = vcmp.ge.s32.totalorder %v232_v5, 1  ;;  %vm1359_vm0 = vcmp.lt.s32.totalorder %v230_v4, 15  ;;  %vm241_vm1 = vmand %vm1327_vm9, %vm1355_vm15  ;;  %vm1379_vm3 = vcmp.lt.s32.totalorder %v231_v3, 15 }
  0x9e   : > { %992 = vmatmul.mubr.msk.bf16.vlgmr.msra.gmra.mrb[4].mxu0 %vm283_vm4, %v991_v21  ;;  %v661_v31 = vsel %vm658_vm6, %v1089_v26, %v1084_v28  ;;  %v662_v32 = vsel %vm658_vm6, %v1090_v25, %v1085_v27  ;;  %v660_v33 = vsel %vm658_vm6, %v1085_v27, %v1090_v25  ;;  %v659_v34 = vsel %vm658_vm6, %v1084_v28, %v1089_v26  ;;  %vm238_vm14 = vmand %vm1335_vm11, %vm1339_vm12 }
  0x9f   : > { %994 = vmatmul.mubr.msk.bf16.vlgmr.msra.gmra.mrb[4].mxu1 %vm283_vm4, %v993_v9  ;;  %543 = vmatpush1.bf16.msra.mxu0 %v996_v10  ;;  %v1098_v35 = vpop.permute.xlu1 %1097  ;;  %v1093_v36 = vpop.permute.xlu0 %1092  ;;  %v666_v37 = vpack.c.bf16 %v662_v32, %v661_v31  ;;  %v665_v10 = vpack.c.bf16 %v660_v33, %v659_v34  ;;  %vm242_vm2 = vmand %vm1335_vm11, %vm1359_vm0 }
  0xa0   : > { %605 = vmatprep.subr.bf16.mxu1 %v601_v30  ;;  %v1100_v38 = vunpack.i.h.bf16 %v1098_v35  ;;  %v1099_v39 = vunpack.i.l.bf16 %v1098_v35  ;;  %v1095_v40 = vunpack.i.h.bf16 %v1093_v36  ;;  %v1094_v41 = vunpack.i.l.bf16 %v1093_v36  ;;  %574 = vmatprep.mubr.bf16.mxu0 %v1125_v8  ;;  %vm245_vm5 = vmand %vm1379_vm3, %vm1331_vm10 }
  0xa1   : > { %606 = vmatpush1.bf16.msra.mxu1 %v600_v29  ;;  %670 = vmatprep.subr.bf16.mxu0 %v666_v37 }
  0xa2   : > { %v725_v42 = vsel %vm723_vm7, %v1095_v40, %v1100_v38  ;;  %v724_v43 = vsel %vm723_vm7, %v1094_v41, %v1099_v39  ;;  %637 = vmatprep.mubr.bf16.mxu1 %v1125_v8  ;;  %v726_v0 = vsel %vm723_vm7, %v1099_v39, %v1094_v41  ;;  %v727_v1 = vsel %vm723_vm7, %v1100_v38, %v1095_v40  ;;  %vm247_vm7 = vmand %vm1379_vm3, %vm1355_vm15 }
  0xa3   : > { %v730_v44 = vpack.c.bf16 %v725_v42, %v724_v43  ;;  %v1108_v46 = vpop.permute.xlu1 %1107  ;;  %v1103_v47 = vpop.permute.xlu0 %1102  ;;  %v731_v48 = vpack.c.bf16 %v727_v1, %v726_v0 }
  0xa4   : > { %v1110_v49 = vunpack.i.h.bf16 %v1108_v46  ;;  %v1109_v50 = vunpack.i.l.bf16 %v1108_v46  ;;  %v1105_v51 = vunpack.i.h.bf16 %v1103_v47  ;;  %v1104_v52 = vunpack.i.l.bf16 %v1103_v47 }
  0xa5   : > { %735 = vmatprep.subr.bf16.mxu1 %v731_v48 }
  0xa6   : > { %998 = vmatmul.mubr.msk.bf16.vlgmr.msra.gmra.mrb[8].mxu0 %vm283_vm4, %v995_v45  ;;  %v791_v54 = vsel %vm788_vm8, %v1109_v50, %v1104_v52  ;;  %v792_v55 = vsel %vm788_vm8, %v1110_v49, %v1105_v51  ;;  %v790_v57 = vsel %vm788_vm8, %v1105_v51, %v1110_v49  ;;  %v789_v58 = vsel %vm788_vm8, %v1104_v52, %v1109_v50 }
  0xa7   : > { %671 = vmatpush1.bf16.msra.mxu0 %v665_v10  ;;  %1000 = vmatmul.mubr.msk.bf16.vlgmr.msra.gmra.mrb[8].mxu1 %vm283_vm4, %v999_v53  ;;  %v796_v56 = vpack.c.bf16 %v792_v55, %v791_v54  ;;  %v795_v59 = vpack.c.bf16 %v790_v57, %v789_v58 }
  0xa8   : > { %736 = vmatpush1.bf16.msra.mxu1 %v730_v44  ;;  %702 = vmatprep.mubr.bf16.mxu0 %v1125_v8 }
  0xa9   : > { %800 = vmatprep.subr.bf16.mxu0 %v796_v56  ;;  %767 = vmatprep.mubr.bf16.mxu1 %v1125_v8 }
  0xae   : > { %1002 = vmatmul.mubr.msk.bf16.vlgmr.msra.gmra.mrb[12].mxu0 %vm283_vm4, %v1001_v60 }
  0xaf   : > { %801 = vmatpush1.bf16.msra.mxu0 %v795_v59  ;;  %1004 = vmatmul.mubr.msk.bf16.vlgmr.msra.gmra.mrb[12].mxu1 %vm283_vm4, %v1003_v61 }
  0xb0   : > { %832 = vmatprep.mubr.bf16.mxu0 %v1125_v8 }
  0xb4   : > { %v253_v20 = vpop.permute.xlu0 %252 }
  0xb6   : > { %1006 = vmatmul.mubr.msk.bf16.vlgmr.msra.gmra.mrb[16].mxu0 %vm283_vm4, %v1005_v62  ;;  %vm1383_vm4 = vcmp.lt.s32.totalorder %v232_v5, 15 }
  0xb7   : > { %vm246_vm6 = vmand %vm1383_vm4, %vm1339_vm12 }
  0xb8   : > { %vm248_vm8 = vmand %vm1383_vm4, %vm1359_vm0 }
 0x169   : > { %v321_v12 = vpop.f32.mrb[0].mxu0 }
 0x16a   : > { %v328_v13 = vsel %vm237_vm13, %v321_v12, 0.0  ;;  %v323_v14 = vpop.f32.mrb[1].mxu0  ;;  %v386_v15 = vpop.f32.mrb[0].mxu1 }
 0x16b   : > { %v329_v16 = vsel %vm238_vm14, %v323_v14, 0.0  ;;  %v393_v18 = vsel %vm1327_vm9, %v386_v15, 0.0  ;;  %v330_v19 = vadd.f32 %v328_v13, %v253_v20  ;;  %v325_v21 = vpop.f32.mrb[2].mxu0  ;;  %v388_v22 = vpop.f32.mrb[1].mxu1  ;;  %v854_v15 = vshrl.u32 %v226_v17, 7 }
 0x16c   : > { %v331_v23 = vadd.f32 %v329_v16, %v253_v20  ;;  %v326_v24 = vpop.f32.mrb[3].mxu0  ;;  %v394_v25 = vsel %vm1335_vm11, %v388_v22, 0.0  ;;  %v390_v26 = vpop.f32.mrb[2].mxu1 }
 0x16d   : > { %v391_v28 = vpop.f32.mrb[3].mxu1  ;;  %v395_v9 = vadd.f32 %v393_v18, %v330_v19  ;;  %v851_v16 = vpop.permute.xlu1 %850  ;;  %v874_v24 = vsub.s32 1, %v854_v15  ;;  %v912_v29 = vsub.s32 3, %v854_v15 }
 0x16e   : > { %v396_v30 = vadd.f32 %v394_v25, %v331_v23  ;;  %v855_v23 = vsub.s32 0, %v854_v15 }
 0x171   : > { %v451_v31 = vpop.f32.mrb[4].mxu0 }
 0x172   : > { %v458_v32 = vsel %vm241_vm1, %v451_v31, 0.0  ;;  %v453_v33 = vpop.f32.mrb[5].mxu0  ;;  %v516_v34 = vpop.f32.mrb[4].mxu1 }
 0x173   : > { %v460_v35 = vadd.f32 %v458_v32, %v395_v9  ;;  %v459_v36 = vsel %vm242_vm2, %v453_v33, 0.0  ;;  %v455_v37 = vpop.f32.mrb[6].mxu0  ;;  %v523_v38 = vsel %vm1331_vm10, %v516_v34, 0.0  ;;  %v518_v39 = vpop.f32.mrb[5].mxu1 }
 0x174   : > { %v461_v40 = vadd.f32 %v459_v36, %v396_v30  ;;  %v456_v41 = vpop.f32.mrb[7].mxu0  ;;  %v524_v42 = vsel %vm1339_vm12, %v518_v39, 0.0  ;;  %v520_v43 = vpop.f32.mrb[6].mxu1  ;;  %v893_v30 = vsub.s32 2, %v854_v15 }
 0x175   : > { %v525_v0 = vadd.f32 %v523_v38, %v460_v35  ;;  %v521_v1 = vpop.f32.mrb[7].mxu1  ;;  %v259_v31 = vpop.permute.xlu1 %258 }
 0x176   : > { %v526_v10 = vadd.f32 %v524_v42, %v461_v40  ;;  %v870_v34 = vpop.permute.xlu0 %869 }
 0x179   : > { %v576_v44 = vpop.f32.mrb[8].mxu0 }
 0x17a   : > { %v583_v45 = vadd.f32 %v576_v44, %v525_v0  ;;  %v578_v46 = vpop.f32.mrb[9].mxu0  ;;  %v639_v47 = vpop.f32.mrb[8].mxu1 }
 0x17b   : > { %v584_v48 = vadd.f32 %v578_v46, %v526_v10  ;;  %v646_v49 = vsel %vm1355_vm15, %v639_v47, 0.0  ;;  %v580_v50 = vpop.f32.mrb[10].mxu0  ;;  %v641_v51 = vpop.f32.mrb[9].mxu1 }
 0x17c   : > { %v648_v52 = vadd.f32 %v646_v49, %v583_v45  ;;  %v647_v53 = vsel %vm1359_vm0, %v641_v51, 0.0  ;;  %v581_v54 = vpop.f32.mrb[11].mxu0  ;;  %v643_v55 = vpop.f32.mrb[10].mxu1 }
 0x17d   : > { %v649_v57 = vadd.f32 %v647_v53, %v584_v48  ;;  %v644_v58 = vpop.f32.mrb[11].mxu1  ;;  %v889_v0 = vpop.permute.xlu1 %888 }
 0x17e   : > { %v908_v47 = vpop.permute.xlu0 %907 }
 0x181   : > { %v704_v60 = vpop.f32.mrb[12].mxu0 }
 0x182   : > { %v711_v61 = vsel %vm245_vm5, %v704_v60, 0.0  ;;  %v706_v62 = vpop.f32.mrb[13].mxu0  ;;  %v769_v63 = vpop.f32.mrb[12].mxu1 }
 0x183   : > { %v713_v2 = vadd.f32 %v711_v61, %v648_v52  ;;  %v712_v3 = vsel %vm246_vm6, %v706_v62, 0.0  ;;  %v708_v4 = vpop.f32.mrb[14].mxu0  ;;  %v776_v5 = vsel %vm1379_vm3, %v769_v63, 0.0  ;;  %v771_v6 = vpop.f32.mrb[13].mxu1 }
 0x184   : > { %v714_v8 = vadd.f32 %v712_v3, %v649_v57  ;;  %v709_v7 = vpop.f32.mrb[15].mxu0  ;;  %v777_v20 = vsel %vm1383_vm4, %v771_v6, 0.0  ;;  %v773_v11 = vpop.f32.mrb[14].mxu1 }
 0x185   : > { %v778_v12 = vadd.f32 %v776_v5, %v713_v2  ;;  %v774_v13 = vpop.f32.mrb[15].mxu1 }
 0x186   : > { %v779_v14 = vadd.f32 %v777_v20, %v714_v8 }
 0x189   : > { %v834_v18 = vpop.f32.mrb[16].mxu0 }
 0x18a   : > { %v841_v19 = vsel %vm247_vm7, %v834_v18, 0.0  ;;  %v836_v21 = vpop.f32.mrb[17].mxu0 }
 0x18b   : > { %v843_v22 = vadd.f32 %v841_v19, %v778_v12  ;;  %v842_v25 = vsel %vm248_vm8, %v836_v21, 0.0  ;;  %v838_v26 = vpop.f32.mrb[18].mxu0 }
 0x18c   : > { %v844_v27 = vadd.f32 %v842_v25, %v779_v14  ;;  %v839_v28 = vpop.f32.mrb[19].mxu0 }
 0x18d   : > { %v845_v9 = vmax.f32 %v843_v22, 0.0 }
 0x18e   : > { %v846_v17 = vmax.f32 %v844_v27, 0.0 }
 0x18f   : > { %v856_v32 = vrot.slane %v845_v9, %v855_v23  ;;  %v875_v33 = vrot.slane %v845_v9, %v874_v24  ;;  %v894_v38 = vrot.slane %v845_v9, %v893_v30  ;;  %v913_v43 = vrot.slane %v845_v9, %v912_v29 }
 0x190   : > { %v860_v35 = vrot.slane %v846_v17, %v855_v23  ;;  %v879_v36 = vrot.slane %v846_v17, %v874_v24  ;;  %v898_v40 = vrot.slane %v846_v17, %v893_v30  ;;  %v917_v44 = vrot.slane %v846_v17, %v912_v29 }
 0x191   : > { %v861_v37 = vmul.f32 %v856_v32, %v851_v16  ;;  %v880_v42 = vmul.f32 %v875_v33, %v870_v34  ;;  %v899_v46 = vmul.f32 %v894_v38, %v889_v0  ;;  %v918_v51 = vmul.f32 %v913_v43, %v908_v47 }
 0x192   : > { %v862_v39 = vmul.f32 %v860_v35, %v851_v16  ;;  %v881_v10 = vmul.f32 %v879_v36, %v870_v34  ;;  %v900_v49 = vmul.f32 %v898_v40, %v889_v0  ;;  %v919_v53 = vmul.f32 %v917_v44, %v908_v47 }
 0x193   : > { %v863_v41 = vadd.f32 %v861_v37, %v259_v31 }
 0x194   : > { %v864_v1 = vadd.f32 %v862_v39, %v259_v31 }
 0x195   : > { %v882_v45 = vadd.f32 %v880_v42, %v863_v41 }
 0x196   : > { %v883_v48 = vadd.f32 %v881_v10, %v864_v1 }
 0x197   : > { %v901_v50 = vadd.f32 %v899_v46, %v882_v45 }
 0x198   : > { %v902_v52 = vadd.f32 %v900_v49, %v883_v48 }
 0x199   : > { %v920_v54 = vadd.f32 %v918_v51, %v901_v50 }
 0x19a   : > { %v921_v55 = vadd.f32 %v919_v53, %v902_v52 }
 0x19b   : > { %922 = vst [vmem:[%s224_s17] sm:$0xff] %v920_v54 }
 0x19c   : > { %923 = vst [vmem:[%s224_s17 + $0x8] sm:$0xff] %v921_v55 }
 0x19d PF: > { %s15_s18 = sadd.s32 1, %s1121_s18  }
 0x19e   : > { %p12_p4 = scmp.ge.s32.totalorder %s15_s18, 4  }
 0x1a0   :  { %14 = sbr.rel (!%p12_p4) target bundleno = 1 (0x1), region = 81 }

</bundles_post_ra>
